<compile_context>
chip_gen: v7x
topology: tpu7x:2x2x1
jax: 0.10.0
libtpu: 0.0.40
codegen_flags: <defaults>
</compile_context>

<pallas_src>
import functools

import jax
import jax.numpy as jnp
from jax.experimental import pallas as pl
from jax.experimental.pallas import tpu as pltpu


def _spatial_attention_kernel(w_ref, x_ref, o_ref, m_ref, *,
                              kernel_size, padding, l_true):
    """Fused channel-max -> 1D 'same' conv -> sigmoid.

    w_ref : SMEM (kernel_size,) f32        conv weights (scalar-prefetched)
    x_ref : VMEM (tn, tc, l_true)          input tile (native dtype)
    o_ref : VMEM (tn, l_pad)               output tile (lane-dense)
    m_ref : VMEM (tn, l_pad) f32 scratch   running channel max
    """
    c_idx = pl.program_id(1)
    tn, l_pad = m_ref.shape

    @pl.when(c_idx == 0)
    def _init():
        # Real columns start at -inf (identity for max); the padded tail
        # columns start at 0 so they act exactly like the conv's zero padding.
        col = jax.lax.broadcasted_iota(jnp.int32, (tn, l_pad), dimension=1)
        m_ref[...] = jnp.where(col < l_true, -jnp.inf, 0.0).astype(jnp.float32)

    x = x_ref[...].astype(jnp.float32)                       # (tn, tc, l_true)
    m_ref[:, :l_true] = jnp.maximum(m_ref[:, :l_true], jnp.max(x, axis=1))

    @pl.when(c_idx == pl.num_programs(1) - 1)
    def _finish():
        m = m_ref[...]                                       # (tn, l_pad) f32
        acc = jnp.zeros((tn, l_pad), dtype=jnp.float32)
        # out[l] = sum_k w[k] * m[l + k - padding]; the zero pad columns
        # (>= l_true, at least `padding` wide) make every wrap-around tap
        # read zeros, so no per-tap masks are needed.
        for k in range(kernel_size):
            shift = (padding - k) % l_pad
            rolled = m if shift == 0 else pltpu.roll(m, shift=shift, axis=1)
            acc = acc + w_ref[k] * rolled
        o_ref[...] = jax.nn.sigmoid(acc).astype(o_ref.dtype)


def _choose_tiles(n, c, l, l_pad, x_bytes, o_bytes, budget):
    """Pick (tn, tc) maximizing tile volume under `budget` bytes of VMEM."""
    def tile_bytes(tn, tc):
        return (2 * tn * tc * l * x_bytes      # double-buffered input tile
                + 2 * tn * l_pad * o_bytes     # double-buffered output tile
                + tn * l_pad * 4)              # f32 max accumulator scratch

    # tn: multiple-of-8 divisors of n (largest first), plus full N.
    tn_cands = [d for d in range((min(n, 1024) // 8) * 8, 0, -8) if n % d == 0]
    if n not in tn_cands:
        tn_cands = [n] + tn_cands
    # tc: full C, or multiple-of-8 divisors of C (keeps (8,128) legality).
    tc_cands = [c] + [m for m in (2048, 1024, 512, 256, 128, 64, 32, 16, 8)
                      if m < c and c % m == 0]

    best = (tn_cands[-1], tc_cands[-1])
    best_key = (-1, -1)
    for tn in tn_cands:
        for tc in tc_cands:
            if tile_bytes(tn, tc) <= budget:
                key = (tn * tc, tc)            # prefer full-C on ties
                if key > best_key:
                    best_key, best = key, (tn, tc)
    return best


def spatial_attention(x, conv_weight, *, kernel_size=7):
    """x: (N, C, L) (any float dtype). conv_weight: (1, 1, kernel_size).

    Returns (N, 1, L) in x.dtype, matching the PyTorch module forward.
    """
    assert kernel_size in (3, 7), "kernel size must be 3 or 7"
    padding = 3 if kernel_size == 7 else 1
    n, c, l = x.shape
    out_dtype = x.dtype
    x_bytes = jnp.dtype(x.dtype).itemsize
    o_bytes = jnp.dtype(out_dtype).itemsize

    # Lane-dense output length, with >= `padding` zero columns for the conv.
    l_pad = ((l + padding + 127) // 128) * 128

    vmem_tile_budget = 20 * 1024 * 1024        # safe on v5e / v6e / v7x
    tn, tc = _choose_tiles(n, c, l, l_pad, x_bytes, o_bytes, vmem_tile_budget)

    w_flat = conv_weight.reshape(kernel_size).astype(jnp.float32)

    kernel = functools.partial(
        _spatial_attention_kernel,
        kernel_size=kernel_size, padding=padding, l_true=l,
    )

    cost = pl.CostEstimate(
        flops=n * c * l + 2 * kernel_size * n * l,
        transcendentals=n * l,
        bytes_accessed=n * c * l * x_bytes + n * l_pad * o_bytes
                       + kernel_size * 4,
    )

    out_padded = pl.pallas_call(
        kernel,
        out_shape=jax.ShapeDtypeStruct((n, l_pad), out_dtype),
        grid_spec=pltpu.PrefetchScalarGridSpec(
            num_scalar_prefetch=1,                      # conv weights -> SMEM
            grid=(n // tn, c // tc),
            in_specs=[
                pl.BlockSpec((tn, tc, l), lambda i, ci, w: (i, ci, 0)),
            ],
            out_specs=pl.BlockSpec((tn, l_pad), lambda i, ci, w: (i, 0)),
            scratch_shapes=[pltpu.VMEM((tn, l_pad), jnp.float32)],
        ),
        compiler_params=pltpu.CompilerParams(
            dimension_semantics=("parallel", "arbitrary"),
            vmem_limit_bytes=32 * 1024 * 1024,
        ),
        cost_estimate=cost,
    )(w_flat, x)

    return out_padded[:, None, :l]


def _reference(x, conv_weight, *, kernel_size=7):
    """Pure-JAX reference (same semantics as the PyTorch forward)."""
    padding = 3 if kernel_size == 7 else 1
    m = jnp.max(x.astype(jnp.float32), axis=1)                 # (N, L)
    padded = jnp.pad(m, ((0, 0), (padding, padding)))
    w = conv_weight.reshape(kernel_size).astype(jnp.float32)
    length = x.shape[-1]
    out = sum(w[k] * padded[:, k:k + length] for k in range(kernel_size))
    return jax.nn.sigmoid(out).astype(x.dtype)[:, None, :]


if __name__ == "__main__":
    key = jax.random.PRNGKey(0)
    k_x, k_w = jax.random.split(key)

    N, C, L = 2, 4, 16
    KERNEL_SIZE = 7

    x = jax.random.normal(k_x, (N, C, L), dtype=jnp.float32)
    # Deterministic Conv1d-style weight (out_ch=1, in_ch=1, kernel_size).
    bound = 1.0 / (1 * KERNEL_SIZE) ** 0.5
    conv_weight = jax.random.uniform(
        k_w, (1, 1, KERNEL_SIZE), minval=-bound, maxval=bound, dtype=jnp.float32
    )

    out = spatial_attention(x, conv_weight, kernel_size=KERNEL_SIZE)
    out = jax.block_until_ready(out)

    ref = _reference(x, conv_weight, kernel_size=KERNEL_SIZE)
    assert out.shape == (N, 1, L), out.shape
    assert jnp.allclose(out, ref, atol=1e-5, rtol=1e-5), "mismatch vs reference"

    print("KERNEL_OK")
</pallas_src>

<mosaic_0001>
module attributes {stable_mosaic.version = 11 : i64} {
  func.func @_spatial_attention_kernel(%arg0: i32, %arg1: i32, %arg2: memref<7xf32, #tpu.memory_space<smem>>, %arg3: memref<2x4x16xf32, #tpu.memory_space<vmem>>, %arg4: memref<2x128xf32, #tpu.memory_space<vmem>>, %arg5: memref<2x128xf32, #tpu.memory_space<vmem>>) attributes {dimension_semantics = [#tpu.dimension_semantics<parallel>, #tpu.dimension_semantics<arbitrary>], iteration_bounds = array<i64: 1, 1>, scalar_prefetch = 1 : i64, scratch_operands = 1 : i64, tpu.core_type = #tpu.core_type<tc>, window_params = [{transform_indices = @transform_0, window_bounds = array<i64: 2, 4, 16>}, {transform_indices = @transform_1, window_bounds = array<i64: 2, 128>}]} {
    %c0_i32 = arith.constant 0 : i32
    %0 = arith.cmpi eq, %arg1, %c0_i32 : i32
    %1 = arith.extui %0 : i1 to i32
    %c0_i32_0 = arith.constant 0 : i32
    %2 = arith.cmpi ne, %1, %c0_i32_0 : i32
    scf.if %2 {
      %11 = tpu.iota {dimensions = array<i32: 1>} : vector<2x128xi32>
      %c16_i32 = arith.constant 16 : i32
      %12 = vector.broadcast %c16_i32 : i32 to vector<2x128xi32>
      %13 = arith.cmpi slt, %11, %12 : vector<2x128xi32>
      %cst_9 = arith.constant 0xFF800000 : f32
      %cst_10 = arith.constant 0.000000e+00 : f32
      %14 = vector.broadcast %cst_9 : f32 to vector<2x128xf32>
      %15 = vector.broadcast %cst_10 : f32 to vector<2x128xf32>
      %16 = arith.select %13, %14, %15 : vector<2x128xi1>, vector<2x128xf32>
      %c0_11 = arith.constant 0 : index
      %c0_12 = arith.constant 0 : index
      %17 = vector.load %arg5[%c0_11, %c0_12] : memref<2x128xf32, #tpu.memory_space<vmem>>, vector<2x128xf32>
      tpu.vector_store %arg5[%c0_11, %c0_12], %16 {strides = array<i32>} : memref<2x128xf32, #tpu.memory_space<vmem>>, vector<2x128xf32>,
    } else {
    }
    %c0 = arith.constant 0 : index
    %c0_1 = arith.constant 0 : index
    %c0_2 = arith.constant 0 : index
    %3 = vector.load %arg3[%c0, %c0_1, %c0_2] : memref<2x4x16xf32, #tpu.memory_space<vmem>>, vector<2x4x16xf32>
    %c0_3 = arith.constant 0 : index
    %c0_4 = arith.constant 0 : index
    %4 = vector.load %arg5[%c0_3, %c0_4] : memref<2x128xf32, #tpu.memory_space<vmem>>, vector<2x16xf32>
    %cst = arith.constant dense<0xFF800000> : vector<2x16xf32>
    %5 = vector.multi_reduction <maximumf>, %3, %cst [1] : vector<2x4x16xf32> to vector<2x16xf32>
    %6 = arith.maximumf %4, %5 : vector<2x16xf32>
    %c0_5 = arith.constant 0 : index
    %c0_6 = arith.constant 0 : index
    %7 = vector.load %arg5[%c0_5, %c0_6] : memref<2x128xf32, #tpu.memory_space<vmem>>, vector<2x16xf32>
    tpu.vector_store %arg5[%c0_5, %c0_6], %6 {strides = array<i32>} : memref<2x128xf32, #tpu.memory_space<vmem>>, vector<2x16xf32>,
    %c0_i32_7 = arith.constant 0 : i32
    %8 = arith.cmpi eq, %arg1, %c0_i32_7 : i32
    %9 = arith.extui %8 : i1 to i32
    %c0_i32_8 = arith.constant 0 : i32
    %10 = arith.cmpi ne, %9, %c0_i32_8 : i32
    scf.if %10 {
      %c0_9 = arith.constant 0 : index
      %c0_10 = arith.constant 0 : index
      %11 = vector.load %arg5[%c0_9, %c0_10] : memref<2x128xf32, #tpu.memory_space<vmem>>, vector<2x128xf32>
      %cst_11 = arith.constant 0.000000e+00 : f32
      %12 = vector.broadcast %cst_11 : f32 to vector<2x128xf32>
      %c3_i32 = arith.constant 3 : i32
      %13 = tpu.dynamic_rotate %11 by %c3_i32 dim 1 : vector<2x128xf32>, i32 -> vector<2x128xf32>
      %c0_12 = arith.constant 0 : index
      %14 = memref.load %arg2[%c0_12] : memref<7xf32, #tpu.memory_space<smem>>
      %15 = vector.broadcast %14 : f32 to vector<2x128xf32>
      %16 = arith.mulf %15, %13 : vector<2x128xf32>
      %17 = arith.addf %12, %16 : vector<2x128xf32>
      %c2_i32 = arith.constant 2 : i32
      %18 = tpu.dynamic_rotate %11 by %c2_i32 dim 1 : vector<2x128xf32>, i32 -> vector<2x128xf32>
      %c1 = arith.constant 1 : index
      %19 = memref.load %arg2[%c1] : memref<7xf32, #tpu.memory_space<smem>>
      %20 = vector.broadcast %19 : f32 to vector<2x128xf32>
      %21 = arith.mulf %20, %18 : vector<2x128xf32>
      %22 = arith.addf %17, %21 : vector<2x128xf32>
      %c1_i32 = arith.constant 1 : i32
      %23 = tpu.dynamic_rotate %11 by %c1_i32 dim 1 : vector<2x128xf32>, i32 -> vector<2x128xf32>
      %c2 = arith.constant 2 : index
      %24 = memref.load %arg2[%c2] : memref<7xf32, #tpu.memory_space<smem>>
      %25 = vector.broadcast %24 : f32 to vector<2x128xf32>
      %26 = arith.mulf %25, %23 : vector<2x128xf32>
      %27 = arith.addf %22, %26 : vector<2x128xf32>
      %c3 = arith.constant 3 : index
      %28 = memref.load %arg2[%c3] : memref<7xf32, #tpu.memory_space<smem>>
      %29 = vector.broadcast %28 : f32 to vector<2x128xf32>
      %30 = arith.mulf %29, %11 : vector<2x128xf32>
      %31 = arith.addf %27, %30 : vector<2x128xf32>
      %c127_i32 = arith.constant 127 : i32
      %32 = tpu.dynamic_rotate %11 by %c127_i32 dim 1 : vector<2x128xf32>, i32 -> vector<2x128xf32>
      %c4 = arith.constant 4 : index
      %33 = memref.load %arg2[%c4] : memref<7xf32, #tpu.memory_space<smem>>
      %34 = vector.broadcast %33 : f32 to vector<2x128xf32>
      %35 = arith.mulf %34, %32 : vector<2x128xf32>
      %36 = arith.addf %31, %35 : vector<2x128xf32>
      %c126_i32 = arith.constant 126 : i32
      %37 = tpu.dynamic_rotate %11 by %c126_i32 dim 1 : vector<2x128xf32>, i32 -> vector<2x128xf32>
      %c5 = arith.constant 5 : index
      %38 = memref.load %arg2[%c5] : memref<7xf32, #tpu.memory_space<smem>>
      %39 = vector.broadcast %38 : f32 to vector<2x128xf32>
      %40 = arith.mulf %39, %37 : vector<2x128xf32>
      %41 = arith.addf %36, %40 : vector<2x128xf32>
      %c125_i32 = arith.constant 125 : i32
      %42 = tpu.dynamic_rotate %11 by %c125_i32 dim 1 : vector<2x128xf32>, i32 -> vector<2x128xf32>
      %c6 = arith.constant 6 : index
      %43 = memref.load %arg2[%c6] : memref<7xf32, #tpu.memory_space<smem>>
      %44 = vector.broadcast %43 : f32 to vector<2x128xf32>
      %45 = arith.mulf %44, %42 : vector<2x128xf32>
      %46 = arith.addf %41, %45 : vector<2x128xf32>
      %47 = arith.negf %46 : vector<2x128xf32>
      %48 = math.exp %47 : vector<2x128xf32>
      %cst_13 = arith.constant 1.000000e+00 : f32
      %49 = vector.broadcast %cst_13 : f32 to vector<2x128xf32>
      %50 = arith.addf %49, %48 : vector<2x128xf32>
      %51 = arith.divf %49, %50 : vector<2x128xf32>
      %c0_14 = arith.constant 0 : index
      %c0_15 = arith.constant 0 : index
      %52 = vector.load %arg4[%c0_14, %c0_15] : memref<2x128xf32, #tpu.memory_space<vmem>>, vector<2x128xf32>
      tpu.vector_store %arg4[%c0_14, %c0_15], %51 {strides = array<i32>} : memref<2x128xf32, #tpu.memory_space<vmem>>, vector<2x128xf32>,
    } else {
    }
    return
  }
  func.func @transform_0(%arg0: i32, %arg1: i32, %arg2: memref<7xf32, #tpu.memory_space<smem>>) -> (i32, i32, i32) {
    %c0_i32 = arith.constant 0 : i32
    %c0_i32_0 = arith.constant 0 : i32
    return %arg0, %arg1, %c0_i32 : i32, i32, i32
  }
  func.func @transform_1(%arg0: i32, %arg1: i32, %arg2: memref<7xf32, #tpu.memory_space<smem>>) -> (i32, i32) {
    %c0_i32 = arith.constant 0 : i32
    %c0_i32_0 = arith.constant 0 : i32
    return %arg0, %c0_i32 : i32, i32
  }
}

</mosaic_0001>

<bundles_post_ra>
// kernel: tpu_custom_call.1
= control target key start
LH: loop header
LB: loop body
LE: loop exit
PB: predicated region body
PF: predicated region fallthrough
CT: control target
= control target key end

     0   :  { %s275_s0 = inlined_call_operand.hbm [shape: f32[7], index: 0, kind: input, shape index: {}]   ;;  %s276_s1 = inlined_call_operand.hbm [shape: f32[2,4,16], index: 1, kind: input, shape index: {}]   ;;  %s277_s2 = inlined_call_operand.hbm [shape: f32[2,128], index: 2, kind: output, shape index: {}]  }
   0x1   :  { %s152_s11 = scalar_lea.hbm %s275_s0, 16 }
   0x2   :  { %p153_p0 = scmp.ne.s32.totalorder %s275_s0, %s152_s11  ;;  %p156_p1 = scmp.lt.u32.totalorder %s152_s11, %s275_s0 }
   0x4   :  { %p158_p2 = pnand %p156_p1, %p153_p0 }
   0x6   :  { %161 = shalt.err (!%p158_p2)  }
   0x7   :  { %s212_s16 = smov [#allocation4]  }
   0x8   :  { %8 = dma.hbm_to_smem %s275_s0, 16, %s212_s16, [#allocation3] }
   0x9   :  { %206 = dma.done.wait [#allocation3], 16 }
   0xa   :  { %207 = vsyncadd [#allocation3], 4294967280 }
   0xb   :  { %10 = sfence }
   0xc   :  { %11 = vsyncpa [#allocation6], 0 }
   0xd   :  { %12 = vsyncpa [#allocation7], 0  ;;  %s213_s19 = smov [#allocation5]   ;;  %s162_s23 = scalar_lea.hbm %s276_s1, 128 }
   0xe   :  { %s18_s20 = sshll.u32 %s213_s19, 4  ;;  %p163_p3 = scmp.ne.s32.totalorder %s276_s1, %s162_s23  ;;  %s19_s20 = int_to_ptr.vmem [resolvable:$true] %s18_s20 }
   0xf   :  { %p166_p4 = scmp.lt.u32.totalorder %s162_s23, %s276_s1 }
  0x11   :  { %p168_p5 = pnand %p166_p4, %p163_p3 }
  0x13   :  { %171 = shalt.err (!%p168_p5)
}
  0x14   :  { %s172_s0 = scalar_lea.vmem %s19_s20, 128  ;;  %p177_p7 = scmp.lt.s32.totalorder %s19_s20, %s19_s20 }
  0x15   :  { %p173_p6 = scmp.ne.s32.totalorder %s19_s20, %s172_s0  ;;  %p178_p8 = scmp.lt.s32.totalorder %s172_s0, %s172_s0 }
  0x17   :  { %p179_p9 = por %p178_p8, %p177_p7 }
  0x19   :  { %p180_p10 = pnand %p179_p9, %p173_p6 }
  0x1b   :  { %183 = shalt.err (!%p180_p10)
}
  0x1c   :  { %s214_s28 = smov 64   ;;  %s215_s29 = smov 4  }
  0x1d   :  { %24 = dma.hbm_to_vmem [thread:$0]  %s276_s1, 128, %s19_s20, [#allocation6], %s214_s28, %s214_s28, %s215_s29  }
  0x1e   :  { %208 = dma.done.wait [#allocation6], 128  }
  0x1f   :  { %209 = vsyncadd [#allocation6], 4294967168  ;;  %v32_v0 = vlaneseq  ;;  %v216_v2 = vmov 0.0   ;;  %vm40_vm1 = vcmask 125952   ;;  %v37_v4 = vld [vmem:[#allocation5] sm:$0xf] }
  0x20   :  { %v38_v5 = vld [vmem:[#allocation5 + $0x4] sm:$0xf]  ;;  %v41_v6 = vsel %vm40_vm1, %v37_v4, -inf  ;;  %vm57_vm2 = vcmask 1041409   ;;  %vm61_vm3 = vcmask 123904   ;;  %s217_s1 = smov 3  }
  0x21   :  { %v33_v1 = vand.u32 127, %v32_v0  ;;  %v48_v7 = vsel %vm40_vm1, %v38_v5, -inf  ;;  %v42_v8 = vrot.slane %v41_v6, 4  ;;  %s218_s4 = smov 1   ;;  %s219_s5 = smov 2  }
  0x22   :  { %v49_v9 = vrot.slane %v48_v7, 4  ;;  %s220_s6 = smov 127   ;;  %s221_s7 = smov 126  }
  0x23   :  { %vm34_vm0 = vcmp.lt.s32.totalorder %v33_v1, 16  ;;  %v43_v10 = vmax.f32 %v41_v6, %v42_v8  ;;  %s222_s8 = smov 125   ;;  %s69_s9 = sld [smem:[#allocation4]] }
  0x24   :  { %v35_v3 = vsel %vm34_vm0, -inf, %v216_v2  ;;  %v50_v11 = vmax.f32 %v48_v7, %v49_v9  ;;  %s129_s10 = sld [smem:[#allocation4 + $0x1]]  ;;  %s130_s11 = sld [smem:[#allocation4 + $0x2]] }
  0x25   :  { %36 = vst [vmem:[#allocation2] sm:$0x3] %v35_v3  ;;  %v44_v12 = vrot.slane %v43_v10, 2  ;;  %s131_s12 = sld [smem:[#allocation4 + $0x3]]  ;;  %s132_s13 = sld [smem:[#allocation4 + $0x4]] }
  0x26   :  { %v51_v13 = vrot.slane %v50_v11, 2  ;;  %s133_s14 = sld [smem:[#allocation4 + $0x5]]  ;;  %s134_s15 = sld [smem:[#allocation4 + $0x6]] }
  0x27   :  { %v45_v14 = vmax.f32 %v43_v10, %v44_v12  ;;  %s223_s16 = smov [#allocation8]  }
  0x28   :  { %v52_v15 = vmax.f32 %v50_v11, %v51_v13  ;;  %s120_s17 = sshll.u32 %s223_s16, 4  ;;  %s121_s17 = int_to_ptr.vmem [resolvable:$true] %s120_s17 }
  0x29   :  { %v46_v16 = vrot.slane %v45_v14, 1  ;;  %v70_v26 = vstv %s69_s9  ;;  %s184_s18 = scalar_lea.vmem %s121_s17, 32  ;;  %p189_p12 = scmp.lt.s32.totalorder %s121_s17, %s121_s17 }
  0x2a   :  { %v53_v17 = vrot.slane %v52_v15, 1  ;;  %v76_v27 = vstv %s129_s10  ;;  %v82_v28 = vstv %s130_s11  ;;  %p185_p11 = scmp.ne.s32.totalorder %s121_s17, %s184_s18  ;;  %p190_p13 = scmp.lt.s32.totalorder %s184_s18, %s184_s18 }
  0x2b   :  { %v47_v19 = vmax.f32 %v45_v14, %v46_v16  ;;  %v86_v30 = vstv %s131_s12  ;;  %v92_v35 = vstv %s132_s13 }
  0x2c   :  { %v39_v18 = vld [vmem:[#allocation2] sm:$0x3]  ;;  %v54_v20 = vmax.f32 %v52_v15, %v53_v17  ;;  %v98_v38 = vstv %s133_s14  ;;  %v104_v42 = vstv %s134_s15  ;;  %p191_p0 = por %p190_p13, %p189_p12 }
  0x2e   :  { %v58_v21 = vsel %vm57_vm2, %v54_v20, %v47_v19  ;;  %p192_p1 = pnand %p191_p0, %p185_p11 }
  0x2f   :  { %v60_v22 = vmax.f32 %v39_v18, %v58_v21 }
  0x31   :  { %62 = vst.msk [vmem:[#allocation2] sm:$0x3] %vm61_vm3, %v60_v22 }
  0x38   :  { %v66_v23 = vld [vmem:[#allocation2] sm:$0x3] }
  0x39   :  { %67 = vrot.lane.b32.xlu0 %v66_v23, %s217_s1  ;;  %79 = vrot.lane.b32.xlu1 %v66_v23, %s218_s4  ;;  %v87_v37 = vmul.f32 %v86_v30, %v66_v23 }
  0x3d   :  { %73 = vrot.lane.b32.xlu0 %v66_v23, %s219_s5  ;;  %89 = vrot.lane.b32.xlu1 %v66_v23, %s220_s6 }
  0x41   :  { %95 = vrot.lane.b32.xlu0 %v66_v23, %s221_s7  ;;  %101 = vrot.lane.b32.xlu1 %v66_v23, %s222_s8 }
  0xab   :  { %v68_v24 = vpop.permute.xlu0 %67  ;;  %v80_v25 = vpop.permute.xlu1 %79 }
  0xac   :  { %v71_v32 = vmul.f32 %v70_v26, %v68_v24  ;;  %v83_v34 = vmul.f32 %v82_v28, %v80_v25 }
  0xaf   :  { %v74_v29 = vpop.permute.xlu0 %73  ;;  %v90_v31 = vpop.permute.xlu1 %89 }
  0xb0   :  { %v77_v33 = vmul.f32 %v76_v27, %v74_v29  ;;  %v93_v41 = vmul.f32 %v92_v35, %v90_v31 }
  0xb2   :  { %v78_v36 = vadd.f32 %v77_v33, %v71_v32 }
  0xb3   :  { %v96_v39 = vpop.permute.xlu0 %95  ;;  %v102_v43 = vpop.permute.xlu1 %101 }
  0xb4   :  { %v84_v40 = vadd.f32 %v83_v34, %v78_v36  ;;  %v99_v45 = vmul.f32 %v98_v38, %v96_v39  ;;  %v105_v47 = vmul.f32 %v104_v42, %v102_v43 }
  0xb6   :  { %v88_v44 = vadd.f32 %v87_v37, %v84_v40 }
  0xb8   :  { %v94_v46 = vadd.f32 %v93_v41, %v88_v44 }
  0xba   :  { %v100_v48 = vadd.f32 %v99_v45, %v94_v46 }
  0xbc   :  { %v106_v49 = vadd.f32 %v105_v47, %v100_v48 }
  0xbe   :  { %v135_v50 = vmul.f32 -1.442695, %v106_v49 }
  0xc0   :  { %148 = vpow2.f32 %v135_v50 }
  0xca   :  { %v149_v51 = vpop.eup %148 }
  0xcb   :  { %v110_v52 = vadd.f32 1.0, %v149_v51 }
  0xcd   :  { %150 = vrcp.f32 %v110_v52 }
  0xd7   :  { %v151_v53 = vpop.eup %150 }
  0xd8   :  { %113 = vst [vmem:[#allocation8] sm:$0x3] %v151_v53 }
  0xd9   :  { %195 = shalt.err (!%p192_p1)
}
  0xda   :  { %s196_s21 = scalar_lea.hbm %s277_s2, 32 }
  0xdb   :  { %p197_p2 = scmp.ne.s32.totalorder %s277_s2, %s196_s21  ;;  %p200_p3 = scmp.lt.u32.totalorder %s196_s21, %s277_s2 }
  0xdd   :  { %p202_p4 = pnand %p200_p3, %p197_p2 }
  0xdf   :  { %205 = shalt.err (!%p202_p4)
}
  0xe0   :  { %123 = dma.vmem_to_hbm [thread:$0]  %s121_s17, 32, %s277_s2, [#allocation7]  }
  0xe1   :  { %210 = dma.done.wait [#allocation7], 32  }
  0xe2   :  { %211 = vsyncadd [#allocation7], 4294967264 }
  0xe3   :  { %127 = vsyncpa [#allocation6], 1 }
  0xe4   :  { %128 = vsyncpa [#allocation7], 1 }

</bundles_post_ra>
